<compile_context>
chip_gen: v6e
topology: v6e:2x2x1
jax: 0.10.0
libtpu: 0.0.40
codegen_flags: <defaults>
</compile_context>

<pallas_src>
import functools

import jax
import jax.numpy as jnp
from jax import lax
from jax.experimental import pallas as pl
from jax.experimental.pallas import tpu as pltpu


def _mha_kernel(k_ref, v_ref, q_ref,
                wk_ref, bk_ref, wq_ref, bq_ref, wv_ref, bv_ref,
                wo_ref, bo_ref,
                o_ref, *, h, dk):
    f32 = jnp.float32

    # Load weights once (constant across the unrolled head loop).
    wk = wk_ref[...]
    wq = wq_ref[...]
    wv = wv_ref[...]
    wo = wo_ref[...]
    cdt = wq.dtype                          # MXU compute dtype (bf16)

    key = k_ref[0].astype(cdt)              # (nk, edim)
    val = v_ref[0].astype(cdt)              # (nk, edim)
    qry = q_ref[0].astype(cdt)              # (tq, edim)

    # Full-width projections: one wide, lane-dense MXU matmul per input.
    k = jnp.dot(key, wk, preferred_element_type=f32) + bk_ref[...]
    q = jnp.dot(qry, wq, preferred_element_type=f32) + bq_ref[...]
    v = jnp.dot(val, wv, preferred_element_type=f32) + bv_ref[...]

    inv_scale = 1.0 / (float(dk) ** 0.5)
    contract_last = (((1,), (1,)), ((), ()))   # contract dk of both operands

    # Statically-unrolled head loop: static lane-slice offsets only; no
    # transposes, no concatenate. Each head's context goes straight through
    # its slice of W_out into a full-width (tq, edim) f32 accumulator.
    acc = None
    for hh in range(h):
        lo = hh * dk
        qh = q[:, lo:lo + dk].astype(cdt)   # (tq, dk)
        kh = k[:, lo:lo + dk].astype(cdt)   # (nk, dk)
        vh = v[:, lo:lo + dk].astype(cdt)   # (nk, dk)

        # S = q_h . k_h^T without materializing the transpose.
        s = lax.dot_general(qh, kh, contract_last,
                            preferred_element_type=f32) * inv_scale  # (tq, nk)
        # f32 softmax; denominator reciprocal goes to the (otherwise idle) EUP.
        s = s - jnp.max(s, axis=-1, keepdims=True)
        p = jnp.exp(s)
        p = p * pl.reciprocal(jnp.sum(p, axis=-1, keepdims=True), approx=True)

        ctx = jnp.dot(p.astype(cdt), vh, preferred_element_type=f32)   # (tq, dk)
        # Fused per-head output projection: lane-dense (tq, edim) contribution.
        contrib = jnp.dot(ctx.astype(cdt), wo[lo:lo + dk, :],
                          preferred_element_type=f32)
        acc = contrib if acc is None else acc + contrib

    o_ref[0] = (acc + bo_ref[...]).astype(o_ref.dtype)


def pack_params(params, compute_dtype=jnp.bfloat16):
    """One-time host-side packing of nn.Linear params.

    Transposes each weight to [in, out] and casts it to the MXU compute dtype
    (bf16 by default); biases stay f32 as (1, edim) rows. Do this once at
    init time -- NOT per forward call -- so the hot path issues no extra HBM
    transpose/cast ops.
    """
    packed = {}
    for name in ("key", "query", "value", "linear"):
        w, b = params[name]
        packed[name] = (jnp.asarray(w).T.astype(compute_dtype),
                        jnp.asarray(b).reshape(1, -1).astype(jnp.float32))
    return packed


def multi_head_attention(key, value, query, packed_params, *, h,
                         tq=None, vmem_limit_bytes=32 * 1024 * 1024):
    """Pallas forward of MultiHeadAttention(h, edim). mask=None path only."""
    bs, nk, edim = key.shape
    nq = query.shape[1]
    dk = edim // h
    assert h * dk == edim, "edim must be divisible by h"

    if tq is None:
        tq = nq                             # single query tile
    assert nq % tq == 0 and (tq == nq or tq % 8 == 0), \
        "tq must divide nq and be a multiple of 8 (or equal nq)"

    wk, bk = packed_params["key"]
    wq, bq = packed_params["query"]
    wv, bv = packed_params["value"]
    wo, bo = packed_params["linear"]

    kv_spec = pl.BlockSpec((1, nk, edim), lambda b, i: (b, 0, 0))
    q_spec = pl.BlockSpec((1, tq, edim), lambda b, i: (b, i, 0))
    w_spec = pl.BlockSpec((edim, edim), lambda b, i: (0, 0))
    b_spec = pl.BlockSpec((1, edim), lambda b, i: (0, 0))

    kernel = functools.partial(_mha_kernel, h=h, dk=dk)

    return pl.pallas_call(
        kernel,
        out_shape=jax.ShapeDtypeStruct((bs, nq, edim), query.dtype),
        grid_spec=pltpu.PrefetchScalarGridSpec(
            num_scalar_prefetch=0,
            grid=(bs, nq // tq),
            in_specs=[
                kv_spec,            # key
                kv_spec,            # value
                q_spec,             # query
                w_spec, b_spec,     # key proj
                w_spec, b_spec,     # query proj
                w_spec, b_spec,     # value proj
                w_spec, b_spec,     # output proj
            ],
            out_specs=q_spec,
        ),
        compiler_params=pltpu.CompilerParams(
            dimension_semantics=("parallel", "parallel"),
            vmem_limit_bytes=vmem_limit_bytes),
    )(key, value, query, wk, bk, wq, bq, wv, bv, wo, bo)


def _ref_mha(key, value, query, params, *, h):
    """Pure-JAX f32 reference mirroring the PyTorch forward (mask=None)."""
    bs, nk, edim = key.shape
    nq = query.shape[1]
    dk = edim // h

    def lin(x, wb):
        w, b = wb
        return x @ w.T + b

    k = lin(key, params["key"]).reshape(bs, nk, h, dk).transpose(0, 2, 1, 3)
    q = lin(query, params["query"]).reshape(bs, nq, h, dk).transpose(0, 2, 1, 3)
    v = lin(value, params["value"]).reshape(bs, nk, h, dk).transpose(0, 2, 1, 3)

    x = jnp.einsum('bhmd,bhnd->bhmn', q, k)
    x = jax.nn.softmax(x / dk ** 0.5, axis=3)
    x = jnp.einsum('bhmn,bhnv->bhmv', x, v)
    x = x.transpose(0, 2, 1, 3).reshape(bs, nq, edim)
    return lin(x, params["linear"])


def _init_params(rng, edim):
    """Deterministic nn.Linear-style init: U(-1/sqrt(in), 1/sqrt(in))."""
    bound = 1.0 / (edim ** 0.5)
    params = {}
    for name in ("key", "query", "value", "linear"):
        rng, kw, kb = jax.random.split(rng, 3)
        w = jax.random.uniform(kw, (edim, edim), jnp.float32, -bound, bound)
        b = jax.random.uniform(kb, (edim,), jnp.float32, -bound, bound)
        params[name] = (w, b)
    return params


if __name__ == "__main__":
    H = 4
    EDIM = 32
    BS = 2
    NK = 8    # nwords_key
    NQ = 16   # nwords_query (2 query tiles of 8 -> exercises the q-tile axis)
    TQ = 8

    root = jax.random.PRNGKey(0)
    k_key, k_val, k_qry, k_par = jax.random.split(root, 4)

    key = jax.random.normal(k_key, (BS, NK, EDIM), jnp.float32)
    value = jax.random.normal(k_val, (BS, NK, EDIM), jnp.float32)
    query = jax.random.normal(k_qry, (BS, NQ, EDIM), jnp.float32)
    params = _init_params(k_par, EDIM)

    packed = pack_params(params)            # one-time host-side packing

    out = multi_head_attention(key, value, query, packed, h=H, tq=TQ)
    out = jax.block_until_ready(out)

    ref = _ref_mha(key, value, query, params, h=H)
    assert out.shape == (BS, NQ, EDIM)
    max_err = jnp.max(jnp.abs(out - ref))
    # bf16 MXU inputs / f32 accumulation: tolerance relaxed vs pure-f32.
    assert jnp.allclose(out, ref, atol=2e-2, rtol=2e-2), \
        f"max abs err {max_err}"

    print("KERNEL_OK")
</pallas_src>

<mosaic_0001>
module attributes {stable_mosaic.version = 11 : i64} {
  func.func @_mha_kernel(%arg0: i32, %arg1: i32, %arg2: memref<1x8x32xf32, #tpu.memory_space<vmem>>, %arg3: memref<1x8x32xf32, #tpu.memory_space<vmem>>, %arg4: memref<1x8x32xf32, #tpu.memory_space<vmem>>, %arg5: memref<32x32xbf16, #tpu.memory_space<vmem>>, %arg6: memref<1x32xf32, #tpu.memory_space<vmem>>, %arg7: memref<32x32xbf16, #tpu.memory_space<vmem>>, %arg8: memref<1x32xf32, #tpu.memory_space<vmem>>, %arg9: memref<32x32xbf16, #tpu.memory_space<vmem>>, %arg10: memref<1x32xf32, #tpu.memory_space<vmem>>, %arg11: memref<32x32xbf16, #tpu.memory_space<vmem>>, %arg12: memref<1x32xf32, #tpu.memory_space<vmem>>, %arg13: memref<1x8x32xf32, #tpu.memory_space<vmem>>) attributes {dimension_semantics = [#tpu.dimension_semantics<parallel>, #tpu.dimension_semantics<parallel>], iteration_bounds = array<i64: 2, 2>, scalar_prefetch = 0 : i64, scratch_operands = 0 : i64, tpu.core_type = #tpu.core_type<tc>, window_params = [{transform_indices = @transform_0, window_bounds = array<i64: 1, 8, 32>}, {transform_indices = @transform_1, window_bounds = array<i64: 1, 8, 32>}, {transform_indices = @transform_2, window_bounds = array<i64: 1, 8, 32>}, {pipeline_mode = #tpu.pipeline_mode<synchronous>, transform_indices = @transform_3, window_bounds = array<i64: 32, 32>}, {pipeline_mode = #tpu.pipeline_mode<synchronous>, transform_indices = @transform_4, window_bounds = array<i64: 1, 32>}, {pipeline_mode = #tpu.pipeline_mode<synchronous>, transform_indices = @transform_5, window_bounds = array<i64: 32, 32>}, {pipeline_mode = #tpu.pipeline_mode<synchronous>, transform_indices = @transform_6, window_bounds = array<i64: 1, 32>}, {pipeline_mode = #tpu.pipeline_mode<synchronous>, transform_indices = @transform_7, window_bounds = array<i64: 32, 32>}, {pipeline_mode = #tpu.pipeline_mode<synchronous>, transform_indices = @transform_8, window_bounds = array<i64: 1, 32>}, {pipeline_mode = #tpu.pipeline_mode<synchronous>, transform_indices = @transform_9, window_bounds = array<i64: 32, 32>}, {pipeline_mode = #tpu.pipeline_mode<synchronous>, transform_indices = @transform_10, window_bounds = array<i64: 1, 32>}, {transform_indices = @transform_11, window_bounds = array<i64: 1, 8, 32>}]} {
    %c0 = arith.constant 0 : index
    %c0_0 = arith.constant 0 : index
    %0 = vector.load %arg5[%c0, %c0_0] : memref<32x32xbf16, #tpu.memory_space<vmem>>, vector<32x32xbf16>
    %c0_1 = arith.constant 0 : index
    %c0_2 = arith.constant 0 : index
    %1 = vector.load %arg7[%c0_1, %c0_2] : memref<32x32xbf16, #tpu.memory_space<vmem>>, vector<32x32xbf16>
    %c0_3 = arith.constant 0 : index
    %c0_4 = arith.constant 0 : index
    %2 = vector.load %arg9[%c0_3, %c0_4] : memref<32x32xbf16, #tpu.memory_space<vmem>>, vector<32x32xbf16>
    %c0_5 = arith.constant 0 : index
    %c0_6 = arith.constant 0 : index
    %3 = vector.load %arg11[%c0_5, %c0_6] : memref<32x32xbf16, #tpu.memory_space<vmem>>, vector<32x32xbf16>
    %c0_7 = arith.constant 0 : index
    %c0_8 = arith.constant 0 : index
    %c0_9 = arith.constant 0 : index
    %4 = vector.load %arg2[%c0_7, %c0_8, %c0_9] : memref<1x8x32xf32, #tpu.memory_space<vmem>>, vector<1x8x32xf32>
    %5 = vector.shape_cast %4 : vector<1x8x32xf32> to vector<8x32xf32>
    %6 = arith.truncf %5 : vector<8x32xf32> to vector<8x32xbf16>
    %c0_10 = arith.constant 0 : index
    %c0_11 = arith.constant 0 : index
    %c0_12 = arith.constant 0 : index
    %7 = vector.load %arg3[%c0_10, %c0_11, %c0_12] : memref<1x8x32xf32, #tpu.memory_space<vmem>>, vector<1x8x32xf32>
    %8 = vector.shape_cast %7 : vector<1x8x32xf32> to vector<8x32xf32>
    %9 = arith.truncf %8 : vector<8x32xf32> to vector<8x32xbf16>
    %c0_13 = arith.constant 0 : index
    %c0_14 = arith.constant 0 : index
    %c0_15 = arith.constant 0 : index
    %10 = vector.load %arg4[%c0_13, %c0_14, %c0_15] : memref<1x8x32xf32, #tpu.memory_space<vmem>>, vector<1x8x32xf32>
    %11 = vector.shape_cast %10 : vector<1x8x32xf32> to vector<8x32xf32>
    %12 = arith.truncf %11 : vector<8x32xf32> to vector<8x32xbf16>
    %cst = arith.constant dense<0.000000e+00> : vector<8x32xf32>
    %13 = tpu.matmul %6, %0, %cst {dimension_numbers = #tpu.dot_dimension_numbers<[1], [0], [0], [1], [0, 0, 1, 1], [], []>} : vector<8x32xbf16>, vector<32x32xbf16>, vector<8x32xf32> -> vector<8x32xf32>
    %c0_16 = arith.constant 0 : index
    %c0_17 = arith.constant 0 : index
    %14 = vector.load %arg6[%c0_16, %c0_17] : memref<1x32xf32, #tpu.memory_space<vmem>>, vector<1x32xf32>
    %15 = vector.broadcast %14 : vector<1x32xf32> to vector<8x32xf32>
    %16 = arith.addf %13, %15 : vector<8x32xf32>
    %cst_18 = arith.constant dense<0.000000e+00> : vector<8x32xf32>
    %17 = tpu.matmul %12, %1, %cst_18 {dimension_numbers = #tpu.dot_dimension_numbers<[1], [0], [0], [1], [0, 0, 1, 1], [], []>} : vector<8x32xbf16>, vector<32x32xbf16>, vector<8x32xf32> -> vector<8x32xf32>
    %c0_19 = arith.constant 0 : index
    %c0_20 = arith.constant 0 : index
    %18 = vector.load %arg8[%c0_19, %c0_20] : memref<1x32xf32, #tpu.memory_space<vmem>>, vector<1x32xf32>
    %19 = vector.broadcast %18 : vector<1x32xf32> to vector<8x32xf32>
    %20 = arith.addf %17, %19 : vector<8x32xf32>
    %cst_21 = arith.constant dense<0.000000e+00> : vector<8x32xf32>
    %21 = tpu.matmul %9, %2, %cst_21 {dimension_numbers = #tpu.dot_dimension_numbers<[1], [0], [0], [1], [0, 0, 1, 1], [], []>} : vector<8x32xbf16>, vector<32x32xbf16>, vector<8x32xf32> -> vector<8x32xf32>
    %c0_22 = arith.constant 0 : index
    %c0_23 = arith.constant 0 : index
    %22 = vector.load %arg10[%c0_22, %c0_23] : memref<1x32xf32, #tpu.memory_space<vmem>>, vector<1x32xf32>
    %23 = vector.broadcast %22 : vector<1x32xf32> to vector<8x32xf32>
    %24 = arith.addf %21, %23 : vector<8x32xf32>
    %25 = vector.extract_strided_slice %20 {offsets = [0, 0], sizes = [8, 8], strides = [1, 1]} : vector<8x32xf32> to vector<8x8xf32>
    %26 = arith.truncf %25 : vector<8x8xf32> to vector<8x8xbf16>
    %27 = vector.extract_strided_slice %16 {offsets = [0, 0], sizes = [8, 8], strides = [1, 1]} : vector<8x32xf32> to vector<8x8xf32>
    %28 = arith.truncf %27 : vector<8x8xf32> to vector<8x8xbf16>
    %29 = vector.extract_strided_slice %24 {offsets = [0, 0], sizes = [8, 8], strides = [1, 1]} : vector<8x32xf32> to vector<8x8xf32>
    %30 = arith.truncf %29 : vector<8x8xf32> to vector<8x8xbf16>
    %cst_24 = arith.constant dense<0.000000e+00> : vector<8x8xf32>
    %31 = tpu.matmul %26, %28, %cst_24 {dimension_numbers = #tpu.dot_dimension_numbers<[1], [1], [0], [0], [0, 0, 1, 0], [], []>} : vector<8x8xbf16>, vector<8x8xbf16>, vector<8x8xf32> -> vector<8x8xf32>
    %cst_25 = arith.constant 0.353553385 : f32
    %32 = vector.broadcast %cst_25 : f32 to vector<8x8xf32>
    %33 = arith.mulf %31, %32 : vector<8x8xf32>
    %cst_26 = arith.constant dense<0xFF800000> : vector<8xf32>
    %34 = vector.multi_reduction <maximumf>, %33, %cst_26 [1] : vector<8x8xf32> to vector<8xf32>
    %35 = vector.shape_cast %34 : vector<8xf32> to vector<8x1xf32>
    %36 = vector.broadcast %35 : vector<8x1xf32> to vector<8x8xf32>
    %37 = arith.subf %33, %36 : vector<8x8xf32>
    %38 = math.exp %37 : vector<8x8xf32>
    %cst_27 = arith.constant dense<0.000000e+00> : vector<8xf32>
    %39 = vector.multi_reduction <add>, %38, %cst_27 [1] : vector<8x8xf32> to vector<8xf32>
    %40 = vector.shape_cast %39 : vector<8xf32> to vector<8x1xf32>
    %41 = tpu.reciprocal %40 {approx = true} : vector<8x1xf32> -> vector<8x1xf32>
    %42 = vector.broadcast %41 : vector<8x1xf32> to vector<8x8xf32>
    %43 = arith.mulf %38, %42 : vector<8x8xf32>
    %44 = arith.truncf %43 : vector<8x8xf32> to vector<8x8xbf16>
    %cst_28 = arith.constant dense<0.000000e+00> : vector<8x8xf32>
    %45 = tpu.matmul %44, %30, %cst_28 {dimension_numbers = #tpu.dot_dimension_numbers<[1], [0], [0], [1], [0, 0, 1, 1], [], []>} : vector<8x8xbf16>, vector<8x8xbf16>, vector<8x8xf32> -> vector<8x8xf32>
    %46 = arith.truncf %45 : vector<8x8xf32> to vector<8x8xbf16>
    %47 = vector.extract_strided_slice %3 {offsets = [0, 0], sizes = [8, 32], strides = [1, 1]} : vector<32x32xbf16> to vector<8x32xbf16>
    %cst_29 = arith.constant dense<0.000000e+00> : vector<8x32xf32>
    %48 = tpu.matmul %46, %47, %cst_29 {dimension_numbers = #tpu.dot_dimension_numbers<[1], [0], [0], [1], [0, 0, 1, 1], [], []>} : vector<8x8xbf16>, vector<8x32xbf16>, vector<8x32xf32> -> vector<8x32xf32>
    %49 = vector.extract_strided_slice %20 {offsets = [0, 8], sizes = [8, 8], strides = [1, 1]} : vector<8x32xf32> to vector<8x8xf32>
    %50 = arith.truncf %49 : vector<8x8xf32> to vector<8x8xbf16>
    %51 = vector.extract_strided_slice %16 {offsets = [0, 8], sizes = [8, 8], strides = [1, 1]} : vector<8x32xf32> to vector<8x8xf32>
    %52 = arith.truncf %51 : vector<8x8xf32> to vector<8x8xbf16>
    %53 = vector.extract_strided_slice %24 {offsets = [0, 8], sizes = [8, 8], strides = [1, 1]} : vector<8x32xf32> to vector<8x8xf32>
    %54 = arith.truncf %53 : vector<8x8xf32> to vector<8x8xbf16>
    %cst_30 = arith.constant dense<0.000000e+00> : vector<8x8xf32>
    %55 = tpu.matmul %50, %52, %cst_30 {dimension_numbers = #tpu.dot_dimension_numbers<[1], [1], [0], [0], [0, 0, 1, 0], [], []>} : vector<8x8xbf16>, vector<8x8xbf16>, vector<8x8xf32> -> vector<8x8xf32>
    %cst_31 = arith.constant 0.353553385 : f32
    %56 = vector.broadcast %cst_31 : f32 to vector<8x8xf32>
    %57 = arith.mulf %55, %56 : vector<8x8xf32>
    %cst_32 = arith.constant dense<0xFF800000> : vector<8xf32>
    %58 = vector.multi_reduction <maximumf>, %57, %cst_32 [1] : vector<8x8xf32> to vector<8xf32>
    %59 = vector.shape_cast %58 : vector<8xf32> to vector<8x1xf32>
    %60 = vector.broadcast %59 : vector<8x1xf32> to vector<8x8xf32>
    %61 = arith.subf %57, %60 : vector<8x8xf32>
    %62 = math.exp %61 : vector<8x8xf32>
    %cst_33 = arith.constant dense<0.000000e+00> : vector<8xf32>
    %63 = vector.multi_reduction <add>, %62, %cst_33 [1] : vector<8x8xf32> to vector<8xf32>
    %64 = vector.shape_cast %63 : vector<8xf32> to vector<8x1xf32>
    %65 = tpu.reciprocal %64 {approx = true} : vector<8x1xf32> -> vector<8x1xf32>
    %66 = vector.broadcast %65 : vector<8x1xf32> to vector<8x8xf32>
    %67 = arith.mulf %62, %66 : vector<8x8xf32>
    %68 = arith.truncf %67 : vector<8x8xf32> to vector<8x8xbf16>
    %cst_34 = arith.constant dense<0.000000e+00> : vector<8x8xf32>
    %69 = tpu.matmul %68, %54, %cst_34 {dimension_numbers = #tpu.dot_dimension_numbers<[1], [0], [0], [1], [0, 0, 1, 1], [], []>} : vector<8x8xbf16>, vector<8x8xbf16>, vector<8x8xf32> -> vector<8x8xf32>
    %70 = arith.truncf %69 : vector<8x8xf32> to vector<8x8xbf16>
    %71 = vector.extract_strided_slice %3 {offsets = [8, 0], sizes = [8, 32], strides = [1, 1]} : vector<32x32xbf16> to vector<8x32xbf16>
    %cst_35 = arith.constant dense<0.000000e+00> : vector<8x32xf32>
    %72 = tpu.matmul %70, %71, %cst_35 {dimension_numbers = #tpu.dot_dimension_numbers<[1], [0], [0], [1], [0, 0, 1, 1], [], []>} : vector<8x8xbf16>, vector<8x32xbf16>, vector<8x32xf32> -> vector<8x32xf32>
    %73 = arith.addf %48, %72 : vector<8x32xf32>
    %74 = vector.extract_strided_slice %20 {offsets = [0, 16], sizes = [8, 8], strides = [1, 1]} : vector<8x32xf32> to vector<8x8xf32>
    %75 = arith.truncf %74 : vector<8x8xf32> to vector<8x8xbf16>
    %76 = vector.extract_strided_slice %16 {offsets = [0, 16], sizes = [8, 8], strides = [1, 1]} : vector<8x32xf32> to vector<8x8xf32>
    %77 = arith.truncf %76 : vector<8x8xf32> to vector<8x8xbf16>
    %78 = vector.extract_strided_slice %24 {offsets = [0, 16], sizes = [8, 8], strides = [1, 1]} : vector<8x32xf32> to vector<8x8xf32>
    %79 = arith.truncf %78 : vector<8x8xf32> to vector<8x8xbf16>
    %cst_36 = arith.constant dense<0.000000e+00> : vector<8x8xf32>
    %80 = tpu.matmul %75, %77, %cst_36 {dimension_numbers = #tpu.dot_dimension_numbers<[1], [1], [0], [0], [0, 0, 1, 0], [], []>} : vector<8x8xbf16>, vector<8x8xbf16>, vector<8x8xf32> -> vector<8x8xf32>
    %cst_37 = arith.constant 0.353553385 : f32
    %81 = vector.broadcast %cst_37 : f32 to vector<8x8xf32>
    %82 = arith.mulf %80, %81 : vector<8x8xf32>
    %cst_38 = arith.constant dense<0xFF800000> : vector<8xf32>
    %83 = vector.multi_reduction <maximumf>, %82, %cst_38 [1] : vector<8x8xf32> to vector<8xf32>
    %84 = vector.shape_cast %83 : vector<8xf32> to vector<8x1xf32>
    %85 = vector.broadcast %84 : vector<8x1xf32> to vector<8x8xf32>
    %86 = arith.subf %82, %85 : vector<8x8xf32>
    %87 = math.exp %86 : vector<8x8xf32>
    %cst_39 = arith.constant dense<0.000000e+00> : vector<8xf32>
    %88 = vector.multi_reduction <add>, %87, %cst_39 [1] : vector<8x8xf32> to vector<8xf32>
    %89 = vector.shape_cast %88 : vector<8xf32> to vector<8x1xf32>
    %90 = tpu.reciprocal %89 {approx = true} : vector<8x1xf32> -> vector<8x1xf32>
    %91 = vector.broadcast %90 : vector<8x1xf32> to vector<8x8xf32>
    %92 = arith.mulf %87, %91 : vector<8x8xf32>
    %93 = arith.truncf %92 : vector<8x8xf32> to vector<8x8xbf16>
    %cst_40 = arith.constant dense<0.000000e+00> : vector<8x8xf32>
    %94 = tpu.matmul %93, %79, %cst_40 {dimension_numbers = #tpu.dot_dimension_numbers<[1], [0], [0], [1], [0, 0, 1, 1], [], []>} : vector<8x8xbf16>, vector<8x8xbf16>, vector<8x8xf32> -> vector<8x8xf32>
    %95 = arith.truncf %94 : vector<8x8xf32> to vector<8x8xbf16>
    %96 = vector.extract_strided_slice %3 {offsets = [16, 0], sizes = [8, 32], strides = [1, 1]} : vector<32x32xbf16> to vector<8x32xbf16>
    %cst_41 = arith.constant dense<0.000000e+00> : vector<8x32xf32>
    %97 = tpu.matmul %95, %96, %cst_41 {dimension_numbers = #tpu.dot_dimension_numbers<[1], [0], [0], [1], [0, 0, 1, 1], [], []>} : vector<8x8xbf16>, vector<8x32xbf16>, vector<8x32xf32> -> vector<8x32xf32>
    %98 = arith.addf %73, %97 : vector<8x32xf32>
    %99 = vector.extract_strided_slice %20 {offsets = [0, 24], sizes = [8, 8], strides = [1, 1]} : vector<8x32xf32> to vector<8x8xf32>
    %100 = arith.truncf %99 : vector<8x8xf32> to vector<8x8xbf16>
    %101 = vector.extract_strided_slice %16 {offsets = [0, 24], sizes = [8, 8], strides = [1, 1]} : vector<8x32xf32> to vector<8x8xf32>
    %102 = arith.truncf %101 : vector<8x8xf32> to vector<8x8xbf16>
    %103 = vector.extract_strided_slice %24 {offsets = [0, 24], sizes = [8, 8], strides = [1, 1]} : vector<8x32xf32> to vector<8x8xf32>
    %104 = arith.truncf %103 : vector<8x8xf32> to vector<8x8xbf16>
    %cst_42 = arith.constant dense<0.000000e+00> : vector<8x8xf32>
    %105 = tpu.matmul %100, %102, %cst_42 {dimension_numbers = #tpu.dot_dimension_numbers<[1], [1], [0], [0], [0, 0, 1, 0], [], []>} : vector<8x8xbf16>, vector<8x8xbf16>, vector<8x8xf32> -> vector<8x8xf32>
    %cst_43 = arith.constant 0.353553385 : f32
    %106 = vector.broadcast %cst_43 : f32 to vector<8x8xf32>
    %107 = arith.mulf %105, %106 : vector<8x8xf32>
    %cst_44 = arith.constant dense<0xFF800000> : vector<8xf32>
    %108 = vector.multi_reduction <maximumf>, %107, %cst_44 [1] : vector<8x8xf32> to vector<8xf32>
    %109 = vector.shape_cast %108 : vector<8xf32> to vector<8x1xf32>
    %110 = vector.broadcast %109 : vector<8x1xf32> to vector<8x8xf32>
    %111 = arith.subf %107, %110 : vector<8x8xf32>
    %112 = math.exp %111 : vector<8x8xf32>
    %cst_45 = arith.constant dense<0.000000e+00> : vector<8xf32>
    %113 = vector.multi_reduction <add>, %112, %cst_45 [1] : vector<8x8xf32> to vector<8xf32>
    %114 = vector.shape_cast %113 : vector<8xf32> to vector<8x1xf32>
    %115 = tpu.reciprocal %114 {approx = true} : vector<8x1xf32> -> vector<8x1xf32>
    %116 = vector.broadcast %115 : vector<8x1xf32> to vector<8x8xf32>
    %117 = arith.mulf %112, %116 : vector<8x8xf32>
    %118 = arith.truncf %117 : vector<8x8xf32> to vector<8x8xbf16>
    %cst_46 = arith.constant dense<0.000000e+00> : vector<8x8xf32>
    %119 = tpu.matmul %118, %104, %cst_46 {dimension_numbers = #tpu.dot_dimension_numbers<[1], [0], [0], [1], [0, 0, 1, 1], [], []>} : vector<8x8xbf16>, vector<8x8xbf16>, vector<8x8xf32> -> vector<8x8xf32>
    %120 = arith.truncf %119 : vector<8x8xf32> to vector<8x8xbf16>
    %121 = vector.extract_strided_slice %3 {offsets = [24, 0], sizes = [8, 32], strides = [1, 1]} : vector<32x32xbf16> to vector<8x32xbf16>
    %cst_47 = arith.constant dense<0.000000e+00> : vector<8x32xf32>
    %122 = tpu.matmul %120, %121, %cst_47 {dimension_numbers = #tpu.dot_dimension_numbers<[1], [0], [0], [1], [0, 0, 1, 1], [], []>} : vector<8x8xbf16>, vector<8x32xbf16>, vector<8x32xf32> -> vector<8x32xf32>
    %123 = arith.addf %98, %122 : vector<8x32xf32>
    %c0_48 = arith.constant 0 : index
    %c0_49 = arith.constant 0 : index
    %124 = vector.load %arg12[%c0_48, %c0_49] : memref<1x32xf32, #tpu.memory_space<vmem>>, vector<1x32xf32>
    %125 = vector.broadcast %124 : vector<1x32xf32> to vector<8x32xf32>
    %126 = arith.addf %123, %125 : vector<8x32xf32>
    %c0_50 = arith.constant 0 : index
    %c0_51 = arith.constant 0 : index
    %c0_52 = arith.constant 0 : index
    %127 = vector.load %arg13[%c0_50, %c0_51, %c0_52] : memref<1x8x32xf32, #tpu.memory_space<vmem>>, vector<1x8x32xf32>
    %128 = vector.shape_cast %127 : vector<1x8x32xf32> to vector<8x32xf32>
    %129 = vector.shape_cast %126 : vector<8x32xf32> to vector<1x8x32xf32>
    tpu.vector_store %arg13[%c0_50, %c0_51, %c0_52], %129 {strides = array<i32>} : memref<1x8x32xf32, #tpu.memory_space<vmem>>, vector<1x8x32xf32>,
    return
  }
  func.func @transform_0(%arg0: i32, %arg1: i32) -> (i32, i32, i32) {
    %c0_i32 = arith.constant 0 : i32
    %c0_i32_0 = arith.constant 0 : i32
    %c0_i32_1 = arith.constant 0 : i32
    return %arg0, %c0_i32, %c0_i32_0 : i32, i32, i32
  }
  func.func @transform_1(%arg0: i32, %arg1: i32) -> (i32, i32, i32) {
    %c0_i32 = arith.constant 0 : i32
    %c0_i32_0 = arith.constant 0 : i32
    %c0_i32_1 = arith.constant 0 : i32
    return %arg0, %c0_i32, %c0_i32_0 : i32, i32, i32
  }
  func.func @transform_2(%arg0: i32, %arg1: i32) -> (i32, i32, i32) {
    %c0_i32 = arith.constant 0 : i32
    %c0_i32_0 = arith.constant 0 : i32
    return %arg0, %arg1, %c0_i32 : i32, i32, i32
  }
  func.func @transform_3(%arg0: i32, %arg1: i32) -> (i32, i32) {
    %c0_i32 = arith.constant 0 : i32
    %c0_i32_0 = arith.constant 0 : i32
    %c0_i32_1 = arith.constant 0 : i32
    return %c0_i32, %c0_i32_0 : i32, i32
  }
  func.func @transform_4(%arg0: i32, %arg1: i32) -> (i32, i32) {
    %c0_i32 = arith.constant 0 : i32
    %c0_i32_0 = arith.constant 0 : i32
    %c0_i32_1 = arith.constant 0 : i32
    return %c0_i32, %c0_i32_0 : i32, i32
  }
  func.func @transform_5(%arg0: i32, %arg1: i32) -> (i32, i32) {
    %c0_i32 = arith.constant 0 : i32
    %c0_i32_0 = arith.constant 0 : i32
    %c0_i32_1 = arith.constant 0 : i32
    return %c0_i32, %c0_i32_0 : i32, i32
  }
  func.func @transform_6(%arg0: i32, %arg1: i32) -> (i32, i32) {
    %c0_i32 = arith.constant 0 : i32
    %c0_i32_0 = arith.constant 0 : i32
    %c0_i32_1 = arith.constant 0 : i32
    return %c0_i32, %c0_i32_0 : i32, i32
  }
  func.func @transform_7(%arg0: i32, %arg1: i32) -> (i32, i32) {
    %c0_i32 = arith.constant 0 : i32
    %c0_i32_0 = arith.constant 0 : i32
    %c0_i32_1 = arith.constant 0 : i32
    return %c0_i32, %c0_i32_0 : i32, i32
  }
  func.func @transform_8(%arg0: i32, %arg1: i32) -> (i32, i32) {
    %c0_i32 = arith.constant 0 : i32
    %c0_i32_0 = arith.constant 0 : i32
    %c0_i32_1 = arith.constant 0 : i32
    return %c0_i32, %c0_i32_0 : i32, i32
  }
  func.func @transform_9(%arg0: i32, %arg1: i32) -> (i32, i32) {
    %c0_i32 = arith.constant 0 : i32
    %c0_i32_0 = arith.constant 0 : i32
    %c0_i32_1 = arith.constant 0 : i32
    return %c0_i32, %c0_i32_0 : i32, i32
  }
  func.func @transform_10(%arg0: i32, %arg1: i32) -> (i32, i32) {
    %c0_i32 = arith.constant 0 : i32
    %c0_i32_0 = arith.constant 0 : i32
    %c0_i32_1 = arith.constant 0 : i32
    return %c0_i32, %c0_i32_0 : i32, i32
  }
  func.func @transform_11(%arg0: i32, %arg1: i32) -> (i32, i32, i32) {
    %c0_i32 = arith.constant 0 : i32
    %c0_i32_0 = arith.constant 0 : i32
    return %arg0, %arg1, %c0_i32 : i32, i32, i32
  }
}

</mosaic_0001>

<bundles_post_ra>
// kernel: tpu_custom_call.1
= control target key start
LH: loop header
LB: loop body
LE: loop exit
PB: predicated region body
PF: predicated region fallthrough
CT: control target
= control target key end

     0   :  { %s2958_s0 = inlined_call_operand.hbm [shape: f32[2,8,32], index: 0, kind: input, shape index: {}]   ;;  %s2959_s1 = inlined_call_operand.hbm [shape: f32[2,8,32], index: 1, kind: input, shape index: {}]   ;;  %s2960_s2 = inlined_call_operand.hbm [shape: f32[2,16,32], index: 2, kind: input, shape index: {}]   ;;  %s2961_s3 = inlined_call_operand.hbm [shape: bf16[32,32], index: 3, kind: input, shape index: {}]   ;;  %s2962_s4 = inlined_call_operand.hbm [shape: f32[1,32], index: 4, kind: input, shape index: {}]   ;;  %s2963_s5 = inlined_call_operand.hbm [shape: bf16[32,32], index: 5, kind: input, shape index: {}]   ;;  %s2964_s6 = inlined_call_operand.hbm [shape: f32[1,32], index: 6, kind: input, shape index: {}]   ;;  %s2965_s7 = inlined_call_operand.hbm [shape: bf16[32,32], index: 7, kind: input, shape index: {}]   ;;  %s2966_s8 = inlined_call_operand.hbm [shape: f32[1,32], index: 8, kind: input, shape index: {}]   ;;  %s2967_s9 = inlined_call_operand.vmem [shape: bf16[32,32], index: 9, kind: input, shape index: {}]   ;;  %s2968_s10 = inlined_call_operand.vmem [shape: f32[1,32], index: 10, kind: input, shape index: {}]   ;;  %s2969_s11 = inlined_call_operand.hbm [shape: f32[2,16,32], index: 11, kind: output, shape index: {}]  }
   0x1   :  { %2987 = sst [smem:[#allocation32_spill]] %s2958_s0 }
   0x2   :  { %2988 = sst [smem:[#allocation33_spill]] %s2959_s1 }
   0x3   :  { %2989 = sst [smem:[#allocation34_spill]] %s2961_s3 }
   0x4   :  { %2990 = sst [smem:[#allocation35_spill]] %s2962_s4 }
   0x5   :  { %2991 = sst [smem:[#allocation36_spill]] %s2963_s5 }
   0x6   :  { %2992 = sst [smem:[#allocation37_spill]] %s2964_s6 }
   0x7   :  { %2993 = sst [smem:[#allocation38_spill]] %s2965_s7 }
   0x8   :  { %2994 = sst [smem:[#allocation39_spill]] %s2966_s8 }
   0x9   :  { %2995 = sst [smem:[#allocation40_spill]] %s2967_s9 }
   0xa   :  { %2996 = sst [smem:[#allocation41_spill]] %s2968_s10 }
   0xb   :  { %2997 = sst [smem:[#allocation42_spill]] %s2969_s11 }
   0xc   :  { %16 = vsyncpa [#allocation3], 0 }
   0xd   :  { %18 = vsyncpa [#allocation3 + $0x1], 0 }
   0xe   :  { %19 = vsyncpa [#allocation6], 0 }
   0xf   :  { %21 = vsyncpa [#allocation6 + $0x1], 0 }
  0x10   :  { %22 = vsyncpa [#allocation9], 0 }
  0x11   :  { %23 = vsyncpa [#allocation12], 0 }
  0x12   :  { %24 = vsyncpa [#allocation15], 0 }
  0x13   :  { %25 = vsyncpa [#allocation4], 0 }
  0x14   :  { %27 = vsyncpa [#allocation4 + $0x1], 0  ;;  %s2476_s17 = smov 0   ;;  %s2478_s18 = smov 0  }
  0x15   :  { %s2480_s19 = smov 0   ;;  %s2482_s20 = smov 0  }
  0x16   :  { %s2484_s21 = smov 0   ;;  %s2486_s22 = smov 0  }
  0x17   :  { %s2488_s23 = smov 0   ;;  %s2490_s24 = smov 0  }
  0x18   :  { %s2492_s25 = smov 0   ;;  %s2494_s26 = smov 0  }
  0x19   :  { %s2496_s27 = smov 0  }
  0x1a LB: > { %2998 = sst [smem:[#allocation25_spill]] %s2373_s21  ;;  %s2532_s28 = sadd.s32 4294967295, %s2397_s27   ;;  %s2397_s27 = sphi %s2496_s27, %s33_s27   ;;  %s2393_s26 = sphi %s2494_s26, %s3059_s26   ;;  %s2389_s25 = sphi %s2492_s25, %s3058_s25   ;;  %s2385_s24 = sphi %s2490_s24, %s3057_s24   ;;  %s2381_s23 = sphi %s2488_s23, %s3056_s23   ;;  %s2377_s22 = sphi %s2486_s22, %s3055_s22   ;;  %s2373_s21 = sphi %s2484_s21, %s3054_s21   ;;  %s2369_s20 = sphi %s2482_s20, %s3048_s20   ;;  %s2365_s19 = sphi %s2480_s19, %s3053_s19   ;;  %s2361_s18 = sphi %s2478_s18, %s3052_s18   ;;  %s2357_s17 = sphi %s2476_s17, %s3051_s17  }
  0x1b   : > { %2999 = sst [smem:[#allocation26_spill]] %s2381_s23  ;;  %p1630_p0 = scmp.ge.s32.totalorder %s2397_s27, 1 }
  0x1c   : > { %3000 = sst [smem:[#allocation27_spill]] %s2385_s24  ;;  %p2972_p1 = scmp.eq.s32.totalorder %s2532_s28, 0 }
  0x1d   : > { %p326_p2 = scmp.lt.s32.totalorder %s2397_s27, 5  ;;  %s2399_s30 = smov [#allocation8]  }
  0x1e   : > { %s338_s12 = sshll.u32 %s2399_s30, 4  ;;  %s2400_s14 = smov [#allocation11]   ;;  %s339_s12 = int_to_ptr.vmem [resolvable:$true] %s338_s12 }
  0x1f   : > { %p2537_p3 = pnand %p1630_p0, %p326_p2  ;;  %s362_s15 = sshll.u32 %s2400_s14, 4  ;;  %s363_s15 = int_to_ptr.vmem [resolvable:$true] %s362_s15 }
  0x20   : > { %s2401_s16 = smov [#allocation14]   ;;  %s2028_s30 = scalar_lea.vmem %s339_s12, 256 }
  0x21   : > { %s3001_s29 = scalar_select %p2537_p3, 1, 0 }
  0x22   : > { %p1847_p4 = pneg %p2537_p3  ;;  %s386_s11 = sshll.u32 %s2401_s16, 4  ;;  %s387_s11 = int_to_ptr.vmem [resolvable:$true] %s386_s11 }
  0x23   : > { %3002 = sst [smem:[#allocation28_spill]] %s3001_s29  ;;  %p2029_p7 = scmp.ne.s32.totalorder %s339_s12, %s2028_s30 }
  0x24   : > { %p2545_p5 = pnand %p1847_p4, %p2972_p1  ;;  %p2036_p10 = scmp.lt.s32.totalorder %s339_s12, %s339_s12 }
  0x25   : > { %p2037_p11 = scmp.lt.s32.totalorder %s2028_s30, %s2028_s30 }
  0x26   : > { %s3003_s13 = scalar_select %p2545_p5, 1, 0 }
  0x27   : > { %p2551_p6 = pneg %p2545_p5  ;;  %p2038_p12 = por %p2037_p11, %p2036_p10 }
  0x29   : > { %p2031_p8 = pnand %p2029_p7, %p2551_p6 }
  0x2b   : > { %p2032_p9 = pneg %p2031_p8 }
  0x2d   : > { %p2039_p13 = pnand %p2038_p12, %p2032_p9 }
  0x2f   : > { %2042 = shalt.err (!%p2039_p13)
}
  0x30   : > { %s2402_s14 = smov 64   ;;  %s2403_s16 = smov 4  }
  0x31   : > { %s3005_s3 = sld [smem:[#allocation34_spill]]  ;;  %s2054_s9 = scalar_lea.vmem %s363_s15, 256 }
  0x32   : > { %p2055_p0 = scmp.ne.s32.totalorder %s363_s15, %s2054_s9  ;;  %p2062_p7 = scmp.lt.s32.totalorder %s363_s15, %s363_s15 }
  0x33   : > { %p2063_p8 = scmp.lt.s32.totalorder %s2054_s9, %s2054_s9 }
  0x34   : > { %p2057_p2 = pnand %p2055_p0, %p2551_p6 }
  0x35   : > { %p2064_p1 = por %p2063_p8, %p2062_p7 }
  0x36   : > { %p2058_p4 = pneg %p2057_p2 }
  0x37   : > { %1850 = dma.hbm_to_vmem [thread:$0]  (!%p2545_p5), %s3005_s3, 256, %s339_s12, [#allocation9], %s2402_s14, %s2402_s14, %s2403_s16  }
  0x38   : > { %p2065_p10 = pnand %p2064_p1, %p2058_p4 }
  0x3a   : > { %2068 = shalt.err (!%p2065_p10)
}
  0x3b   : > { %s3006_s5 = sld [smem:[#allocation36_spill]]  ;;  %s2080_s23 = scalar_lea.vmem %s387_s11, 256 }
  0x3c   : > { %p2081_p9 = scmp.ne.s32.totalorder %s387_s11, %s2080_s23  ;;  %p2088_p13 = scmp.lt.s32.totalorder %s387_s11, %s387_s11 }
  0x3d   : > { %p2089_p0 = scmp.lt.s32.totalorder %s2080_s23, %s2080_s23 }
  0x3e   : > { %p2083_p11 = pnand %p2081_p9, %p2551_p6 }
  0x3f   : > { %p2090_p2 = por %p2089_p0, %p2088_p13 }
  0x40   : > { %p2084_p12 = pneg %p2083_p11 }
  0x41   : > { %1856 = dma.hbm_to_vmem [thread:$0]  (!%p2545_p5), %s3006_s5, 256, %s363_s15, [#allocation12], %s2402_s14, %s2402_s14, %s2403_s16  }
  0x42   : > { %p2091_p3 = pnand %p2090_p2, %p2084_p12 }
  0x44   : > { %2094 = shalt.err (!%p2091_p3)
}
  0x45   : > { %s3007_s7 = sld [smem:[#allocation38_spill]]  ;;  %p59_p1 = scmp.ne.s32.totalorder %s2377_s22, %s2373_s21 }
  0x46   : > { %p2980_p3 = scmp.eq.s32.totalorder %s2397_s27, 0  ;;  %p65_p4 = scmp.ne.s32.totalorder %s2373_s21, %s2369_s20 }
  0x47   : > { %p2979_p7 = scmp.lt.s32.totalorder %s2397_s27, 4  ;;  %s2975_s15 = sand.u32 1, %s2377_s22  }
  0x48   : > { %p61_p8 = por %p2980_p3, %p59_p1  ;;  %p3008_p10 = scmp.eq.s32.totalorder %s2532_s28, 0 }
  0x49   : > { %s2595_s23 = sshll.u32 %s2975_s15, 3  ;;  %s1639_s9 = sshll.u32 %s2393_s26, 7 }
  0x4a   : > { %p2589_p9 = por %p3008_p10, %p65_p4  ;;  %p2600_p11 = pnand %p2979_p7, %p61_p8 }
  0x4b   : > { %1862 = dma.hbm_to_vmem [thread:$0]  (!%p2545_p5), %s3007_s7, 256, %s387_s11, [#allocation15], %s2402_s14, %s2402_s14, %s2403_s16  }
  0x4c   : > { %s3009_s30 = scalar_select %p2589_p9, 1, 0 }
  0x4d   : > { %s435_s20 = sand.u32 1, %s2397_s27   ;;  %s3012_s1 = sld [smem:[#allocation33_spill]] }
  0x4e   : > { %3010 = sst [smem:[#allocation29_spill]] %s3009_s30  ;;  %s439_s12 = scalar_lea.vmem [#allocation5], %s2595_s23 }
  0x4f   : > { %s446_s29 = sshll.u32 %s439_s12, 4  ;;  %s2404_s15 = smov [#allocation10]   ;;  %s447_s29 = int_to_ptr.vmem [resolvable:$true] %s446_s29 }
  0x50   : > { %s352_s3 = sshll.u32 %s2404_s15, 4  ;;  %s2611_s5 = scalar_lea.sflag [#allocation6], %s435_s20  ;;  %s353_s3 = int_to_ptr.vmem [resolvable:$true] %s352_s3 }
  0x51   : > { %p2981_p12 = pneg %p2600_p11  ;;  %s2108_s7 = scalar_lea.vmem %s447_s29, 128 }
  0x52   : > { %p2109_p13 = scmp.ne.s32.totalorder %s447_s29, %s2108_s7  ;;  %s2405_s30 = smov [#allocation5]  }
  0x53   : > { %s444_s24 = scalar_lea.hbm %s3012_s1, %s1639_s9  ;;  %s2113_s21 = sshll.u32 %s2405_s30, 4  ;;  %s2114_s21 = int_to_ptr.vmem [resolvable:$false] %s2113_s21 }
  0x54   : > { %p2111_p0 = pnand %p2109_p13, %p2981_p12  ;;  %s2115_s14 = scalar_lea.vmem %s2114_s21, 256 }
  0x55   : > { %p2116_p1 = scmp.lt.s32.totalorder %s447_s29, %s2114_s21  ;;  %p2117_p4 = scmp.lt.s32.totalorder %s2115_s14, %s2108_s7 }
  0x56   : > { %p2112_p2 = pneg %p2111_p0 }
  0x57   : > { %p2118_p8 = por %p2117_p4, %p2116_p1 }
  0x59   : > { %p2119_p10 = pnand %p2118_p8, %p2112_p2 }
  0x5b   : > { %2122 = shalt.err (!%p2119_p10)
}
  0x5c   : > { %1872 = dma.hbm_to_vmem [thread:$0]  (!%p2600_p11), %s444_s24, 128, %s447_s29, %s2611_s5  }
  0x5d   : > { %s2134_s12 = scalar_lea.vmem %s353_s3, 16  ;;  %s2141_s15 = scalar_lea.vmem %s353_s3, 32 }
  0x5e   : > { %p2135_p7 = scmp.ne.s32.totalorder %s353_s3, %s2134_s12  ;;  %p2142_p3 = scmp.lt.s32.totalorder %s353_s3, %s353_s3 }
  0x5f   : > { %p2143_p12 = scmp.lt.s32.totalorder %s2141_s15, %s2134_s12 }
  0x60   : > { %p2137_p13 = pnand %p2135_p7, %p2551_p6 }
  0x61   : > { %p2144_p9 = por %p2143_p12, %p2142_p3 }
  0x62   : > { %p2138_p0 = pneg %p2137_p13 }
  0x64   : > { %p2145_p5 = pnand %p2144_p9, %p2138_p0 }
  0x66   : > { %2148 = shalt.err (!%p2145_p5)
}
  0x67   : > { %p3013_p2 = scmp.ne.s32.totalorder %s3003_s13, 0  ;;  %s3014_s4 = sld [smem:[#allocation35_spill]] }
  0x68   : > { %s2406_s29 = smov [#allocation13]   ;;  %s2407_s20 = smov [#allocation16]  }
  0x69   : > { %s376_s30 = sshll.u32 %s2406_s29, 4  ;;  %s400_s16 = sshll.u32 %s2407_s20, 4  ;;  %s377_s30 = int_to_ptr.vmem [resolvable:$true] %s376_s30  ;;  %s401_s16 = int_to_ptr.vmem [resolvable:$true] %s400_s16 }
  0x6a   : > { %s2160_s24 = scalar_lea.vmem %s377_s30, 16  ;;  %s2167_s14 = scalar_lea.vmem %s377_s30, 32 }
  0x6b   : > { %p2161_p7 = scmp.ne.s32.totalorder %s377_s30, %s2160_s24  ;;  %p2168_p3 = scmp.lt.s32.totalorder %s377_s30, %s377_s30 }
  0x6c   : > { %p2169_p5 = scmp.lt.s32.totalorder %s2167_s14, %s2160_s24 }
  0x6d   : > { %1853 = dma.hbm_to_vmem [thread:$0]  (!%p3013_p2), %s3014_s4, 16, %s353_s3, [#allocation9]  }
  0x6e   : > { %p2163_p1 = pnand %p2161_p7, %p2551_p6  ;;  %p2170_p9 = por %p2169_p5, %p2168_p3 }
  0x70   : > { %p2164_p4 = pneg %p2163_p1 }
  0x72   : > { %p2171_p12 = pnand %p2170_p9, %p2164_p4 }
  0x74   : > { %2174 = shalt.err (!%p2171_p12)
}
  0x75   : > { %s3015_s6 = sld [smem:[#allocation37_spill]]  ;;  %s2186_s15 = scalar_lea.vmem %s401_s16, 16 }
  0x76   : > { %p2187_p8 = scmp.ne.s32.totalorder %s401_s16, %s2186_s15  ;;  %s2193_s7 = scalar_lea.vmem %s401_s16, 32 }
  0x77   : > { %p2194_p0 = scmp.lt.s32.totalorder %s401_s16, %s401_s16  ;;  %p2195_p7 = scmp.lt.s32.totalorder %s2193_s7, %s2186_s15 }
  0x78   : > { %p2189_p10 = pnand %p2187_p8, %p2551_p6 }
  0x79   : > { %p2196_p1 = por %p2195_p7, %p2194_p0 }
  0x7a   : > { %p2190_p13 = pneg %p2189_p10 }
  0x7b   : > { %1859 = dma.hbm_to_vmem [thread:$0]  (!%p3013_p2), %s3015_s6, 16, %s377_s30, [#allocation12]  }
  0x7c   : > { %p2197_p3 = pnand %p2196_p1, %p2190_p13 }
  0x7e   : > { %2200 = shalt.err (!%p2197_p3)
}
  0x7f   : > { %s3016_s8 = sld [smem:[#allocation39_spill]]  ;;  %s421_s24 = scalar_lea.vmem [#allocation2], %s2595_s23 }
  0x80   : > { %s3017_s0 = sld [smem:[#allocation32_spill]]  ;;  %s428_s14 = sshll.u32 %s421_s24, 4  ;;  %s429_s14 = int_to_ptr.vmem [resolvable:$true] %s428_s14 }
  0x81   : > { %s3018_s12 = sand.u32 1, %s2377_s22   ;;  %s2214_s15 = scalar_lea.vmem %s429_s14, 128 }
  0x82   : > { %s418_s3 = scalar_lea.sflag [#allocation3], %s3018_s12  ;;  %p2215_p6 = scmp.ne.s32.totalorder %s429_s14, %s2214_s15 }
  0x83   : > { %p3019_p4 = pneg %p2600_p11  ;;  %s2408_s13 = smov [#allocation2]  }
  0x84   : > { %s2219_s7 = sshll.u32 %s2408_s13, 4  ;;  %s2220_s7 = int_to_ptr.vmem [resolvable:$false] %s2219_s7 }
  0x85   : > { %1865 = dma.hbm_to_vmem [thread:$0]  (!%p3013_p2), %s3016_s8, 16, %s401_s16, [#allocation15]  }
  0x86   : > { %s426_s20 = scalar_lea.hbm %s3017_s0, %s1639_s9  ;;  %p2217_p5 = pnand %p2215_p6, %p3019_p4 }
  0x87   : > { %s2221_s16 = scalar_lea.vmem %s2220_s7, 256  ;;  %p2222_p2 = scmp.lt.s32.totalorder %s429_s14, %s2220_s7 }
  0x88   : > { %p2218_p9 = pneg %p2217_p5  ;;  %p2223_p12 = scmp.lt.s32.totalorder %s2221_s16, %s2214_s15 }
  0x8a   : > { %p2224_p8 = por %p2223_p12, %p2222_p2 }
  0x8c   : > { %p2225_p10 = pnand %p2224_p8, %p2218_p9 }
  0x8e   : > { %2228 = shalt.err (!%p2225_p10)
}
  0x8f   : > { %1869 = dma.hbm_to_vmem [thread:$0]  (!%p2600_p11), %s426_s20, 128, %s429_s14, %s418_s3  }
  0x90   : > { %s1629_s23 = sadd.s32 4294967294, %s2397_s27   ;;  %s42_s9 = sadd.s32 1, %s2389_s25 }
  0x91   : > { %p43_p13 = scmp.ge.s32.totalorder %s42_s9, 2  ;;  %s106_s11 = sadd.s32 1, %s2365_s19 }
  0x92   : > { %p113_p0 = scmp.ne.s32.totalorder %s2365_s19, %s2361_s18  ;;  %p119_p7 = scmp.ne.s32.totalorder %s2361_s18, %s2357_s17 }
  0x93   : > { %s3061_s9 = smov (%p43_p13, %s42_s9), 0  ;;  %s3021_s21 = sadd.s32 1, %s2393_s26 }
  0x94   : > { %3020 = sst [smem:[#allocation30_spill]] %s3061_s9  ;;  %s3063_s21 = smov (!%p43_p13, %s3021_s21), %s2393_s26 }
  0x95   : > { %s102_s29 = ssub.s32 %s2389_s25, %s3061_s9  ;;  %p3022_p1 = scmp.eq.s32.totalorder %s2397_s27, 0 }
  0x96   : > { %p47_p11 = scmp.ge.s32.totalorder %s3063_s21, 2  ;;  %p3024_p6 = scmp.eq.s32.totalorder %s2532_s28, 0 }
  0x97   : > { %p2671_p3 = por %p113_p0, %p3022_p1  ;;  %p313_p5 = scmp.eq.s32.totalorder %s2532_s28, 3 }
  0x98   : > { %p2677_p4 = por %p119_p7, %p3024_p6  ;;  %p319_p9 = scmp.eq.s32.totalorder %s1629_s23, 3 }
  0x99   : > { %s3065_s21 = smov (%p47_p11, %s3063_s21), 0  ;;  %p2684_p2 = por %p313_p5, %p113_p0 }
  0x9a   : > { %3026 = sst [smem:[#allocation31_spill]] %s3065_s21  ;;  %p2688_p12 = por %p319_p9, %p119_p7 }
  0x9b   : > { %s49_s14 = ssub.s32 %s2393_s26, %s3065_s21  ;;  %s455_s12 = sand.u32 1, %s2365_s19  }
  0x9c   : > { %p50_p8 = scmp.eq.s32.totalorder %s49_s14, 0  ;;  %s103_s3 = sor.u32 %s102_s29, %s49_s14 }
  0x9d   : > { %p104_p10 = scmp.eq.s32.totalorder %s103_s3, 0  ;;  %s1642_s15 = sshll.u32 %s455_s12, 3 }
  0x9e   : > { %s3029_s13 = sadd.s32 1, %s2377_s22  ;;  %s1643_s23 = sshll.u32 %s2393_s26, 1 }
  0x9f   : > { %s2698_s7 = scalar_select %p50_p8, %s2377_s22, %s3029_s13  }
  0xa0   : > { %s2701_s16 = scalar_select %p104_p10, %s2365_s19, %s106_s11  }
  0xa1   : > { %s462_s0 = sadd.s32 %s2389_s25, %s1643_s23  ;;  %s457_s1 = scalar_lea.vmem [#allocation7], %s1642_s15 }
  0xa2   : > { %s466_s4 = sshll.u32 %s457_s1, 4  ;;  %s1644_s6 = sshll.u32 %s462_s0, 7  ;;  %s467_s4 = int_to_ptr.vmem [resolvable:$true] %s466_s4 }
  0xa3   : > { %s464_s21 = scalar_lea.hbm %s2960_s2, %s1644_s6  ;;  %p3030_p13 = scmp.lt.s32.totalorder %s2397_s27, 4 }
  0xa4   : > { %s2242_s11 = scalar_lea.vmem %s467_s4, 128  ;;  %s2409_s1 = smov [#allocation7]  }
  0xa5   : > { %p2712_p0 = pnand %p3030_p13, %p2671_p3  ;;  %p2243_p1 = scmp.ne.s32.totalorder %s467_s4, %s2242_s11 }
  0xa6   : > { %s2247_s0 = sshll.u32 %s2409_s1, 4  ;;  %s2248_s0 = int_to_ptr.vmem [resolvable:$false] %s2247_s0 }
  0xa7   : > { %p2231_p7 = pneg %p2712_p0  ;;  %s2249_s14 = scalar_lea.vmem %s2248_s0, 256 }
  0xa8   : > { %p2250_p5 = scmp.lt.s32.totalorder %s467_s4, %s2248_s0  ;;  %p2251_p9 = scmp.lt.s32.totalorder %s2249_s14, %s2242_s11 }
  0xa9   : > { %p2245_p11 = pnand %p2243_p1, %p2231_p7 }
  0xaa   : > { %p2252_p8 = por %p2251_p9, %p2250_p5 }
  0xab   : > { %p2246_p6 = pneg %p2245_p11 }
  0xad   : > { %p2253_p10 = pnand %p2252_p8, %p2246_p6 }
  0xaf   : > { %2256 = shalt.err (!%p2253_p10)
}
  0xb0   : > { %1875 = dma.hbm_to_vmem [thread:$0]  (!%p2712_p0), %s464_s21, 128, %s467_s4, %s2611_s5  }
  0xb1   : > { %s3032_s6 = sld [smem:[#allocation28_spill]] }
  0xb7   : > { %p3033_p3 = scmp.ne.s32.totalorder %s3032_s6, 0 }
  0xb8   : > { %s3034_s8 = sld [smem:[#allocation25_spill]] (!%p3033_p3) }
  0xb9   : > { %475 = sbr.rel (%p3033_p3) target bundleno = 2685 (0xa7d), region = 64  ;;  %s3035_s9 = sld [smem:[#allocation29_spill]] (!%p3033_p3) }
  0xbe   : > { %s477_s10 = sand.u32 1, %s3034_s8  }
  0xbf   : > { %s2724_s12 = sshll.u32 %s477_s10, 3  ;;  %s478_s3 = scalar_lea.sflag [#allocation3], %s477_s10 }
  0xc0   : > { %s481_s15 = scalar_lea.vmem [#allocation2], %s2724_s12  ;;  %p3036_p13 = scmp.ne.s32.totalorder %s3035_s9, 0 }
  0xc2   : > { %2328 = dma.done.wait (%p3036_p13), %s478_s3, 128  }
  0xc3   : > { %2330 = vsyncadd (%p3036_p13), %s478_s3, 4294967168  ;;  %s486_s4 = sand.u32 1, %s2532_s28   ;;  %s490_s21 = scalar_lea.vmem [#allocation5], %s2724_s12 }
  0xc4   : > { %s487_s5 = scalar_lea.sflag [#allocation6], %s486_s4 }
  0xc5   : > { %2332 = dma.done.wait (%p3036_p13), %s487_s5, 128  }
  0xc6   : > { %2334 = vsyncadd (%p3036_p13), %s487_s5, 4294967168  ;;  %s497_s13 = sand.u32 1, %s2361_s18  }
  0xc7   : > { %s2740_s23 = sshll.u32 %s497_s13, 3 }
  0xc8   : > { %s499_s29 = scalar_lea.vmem [#allocation7], %s2740_s23 }
  0xc9   : > { %2336 = dma.done.wait (%p2677_p4), %s487_s5, 128  }
  0xca   : > { %2338 = vsyncadd (%p2677_p4), %s487_s5, 4294967168  ;;  %p3037_p0 = scmp.eq.s32.totalorder %s2532_s28, 0 }
  0xcc   : > { %2340 = dma.done.wait (%p3037_p0), [#allocation9], 272   ;;  %p3038_p7 = pmov %p3037_p0 }
  0xcd   : > { %p3039_p1 = pmov %p3037_p0 }
  0xce   : > { %2342 = vsyncadd (%p3038_p7), [#allocation9], 4294967024 }
  0xcf   : > { %2344 = dma.done.wait (%p3039_p1), [#allocation12], 272   ;;  %p3040_p11 = pmov %p3037_p0 }
  0xd0   : > { %p3041_p6 = pmov %p3037_p0 }
  0xd1   : > { %2346 = vsyncadd (%p3040_p11), [#allocation12], 4294967024 }
  0xd2   : > { %2348 = dma.done.wait (%p3041_p6), [#allocation15], 272   ;;  %p3042_p5 = pmov %p3037_p0 }
  0xd3   : > { %v2410_v0 = vmov 0.0   ;;  %vm2411_vm0 = vmmov 0   ;;  %v1995_v1 = vld [vmem:[#allocation8 + $0x8] sm:$0xff]   ;;  %v1996_v2 = vld [vmem:[#allocation11 + $0x8] sm:$0xff]   ;;  %v1998_v5 = vld [vmem:[#allocation11] sm:$0xff]   ;;  %vm614_vm1 = vcmask 261120  }
  0xd4   : > { %2350 = vsyncadd (%p3042_p5), [#allocation15], 4294967024  ;;  %1719 = vmatprep.subr.bf16.mxu0 %v2410_v0  ;;  %1727 = vmatprep.subr.bf16.mxu1 %v2410_v0  ;;  %v1997_v3 = vld [vmem:[#allocation8] sm:$0xff]   ;;  %v589_v4 = vld [vmem:[%s481_s15] sm:$0xff]  ;;  %vm785_vm2 = vcmask 64512   ;;  %s2412_s28 = smov 120  }
  0xd5   : > { %1723 = vmatprep.mubr.msk.bf16.mxu0 %vm2411_vm0, %v2410_v0  ;;  %1731 = vmatprep.mubr.msk.bf16.mxu1 %vm2411_vm0, %v2410_v0  ;;  %v593_v6 = vld [vmem:[%s499_s29] sm:$0xff]  ;;  %v590_v7 = vpack.c.bf16 %v589_v4, %v589_v4  ;;  %v1660_v10 = vld [vmem:[#allocation13] ss:$0 sm:$0xff]  ;;  %v2000_v25 = vld [vmem:[#allocation14] sm:$0xff]   ;;  %vm848_vm3 = vcmask 1043456   ;;  %s2413_s30 = smov 112  }
  0xd6   : > { %1720 = vmatpush3.bf16.msra.mxu0 %v1995_v1  ;;  %1728 = vmatpush3.bf16.msra.mxu1 %v1996_v2  ;;  %v594_v8 = vpack.c.bf16 %v593_v6, %v593_v6  ;;  %v1656_v9 = vld [vmem:[#allocation10] ss:$0 sm:$0xff]  ;;  %v591_v26 = vld [vmem:[%s490_s21] sm:$0xff]  ;;  %v1664_v52 = vld [vmem:[#allocation16] ss:$0 sm:$0xff]  ;;  %s3043_s0 = sld [smem:[#allocation40_spill]] }
  0xd7   : > { %1721 = vmatprep.subr.bf16.mxu0 %v2410_v0  ;;  %1729 = vmatprep.subr.bf16.mxu1 %v2410_v0  ;;  %v1999_v24 = vld [vmem:[#allocation14 + $0x8] sm:$0xff]   ;;  %v592_v27 = vpack.c.bf16 %v591_v26, %v591_v26  ;;  %s2414_s8 = smov 104   ;;  %s3044_s15 = sld [smem:[#allocation27_spill]] }
  0xd8   : > { %s3045_s4 = sld [smem:[#allocation26_spill]]  ;;  %s571_s1 = scalar_lea.vmem [#allocation17], %s2740_s23 }
  0xd9   : > { %s1443_s14 = sshll.u32 %s571_s1, 4  ;;  %s3047_s9 = sld [smem:[#allocation42_spill]]  ;;  %s2896_s14 = int_to_ptr.vmem [resolvable:$true] %s1443_s14 }
  0xda   : > { %1722 = vmatpush3.bf16.msra.mxu0 %v1997_v3  ;;  %1730 = vmatpush3.bf16.msra.mxu1 %v1998_v5  ;;  %s1428_s23 = scalar_lea.sflag [#allocation4], %s497_s13  ;;  %s2257_s12 = scalar_lea.vmem %s2896_s14, 128 }
  0xdb   : > { %1735 = vmatprep.subr.bf16.mxu0 %v2410_v0  ;;  %1743 = vmatprep.subr.bf16.mxu1 %v2410_v0  ;;  %p2258_p4 = scmp.ne.s32.totalorder %s2896_s14, %s2257_s12  ;;  %s2415_s3 = smov [#allocation17]  }
  0xdc   : > { %v586_v2 = vld [vmem:[%s3043_s0 + $0x4] sm:$0xf] }
  0xdd   : > { %1724 = vmatmul.mubr.msk.bf16.vlgmr.msra.gmra.mxu0 %vm614_vm1, %v590_v7  ;;  %1732 = vmatmul.mubr.msk.bf16.vlgmr.msra.gmra.mxu1 %vm614_vm1, %v594_v8  ;;  %v1012_v3 = vsel %vm848_vm3, %v586_v2, 0  ;;  %v585_v8 = vld [vmem:[%s3043_s0] sm:$0xf]  ;;  %s1682_s5 = sshll.u32 %s3044_s15, 1  ;;  %p2259_p9 = pnand %p2258_p4, %p2684_p2 }
  0xde   : > { %1739 = vmatprep.mubr.msk.bf16.mxu0 %vm2411_vm0, %v2410_v0  ;;  %1745 = vmatprep.mubr.msk.bf16.mxu1 %vm2411_vm0, %v2410_v0  ;;  %s1439_s21 = sadd.s32 %s3045_s4, %s1682_s5  ;;  %s2261_s15 = sshll.u32 %s2415_s3, 4  ;;  %s2262_s15 = int_to_ptr.vmem [resolvable:$false] %s2261_s15 }
  0xdf   : > { %1736 = vmatpush3.bf16.msra.mxu0 %v1999_v24  ;;  %s1683_s11 = sshll.u32 %s1439_s21, 7  ;;  %p2260_p8 = pneg %p2259_p9 }
  0xe0   : > { %1737 = vmatprep.subr.bf16.mxu0 %v2410_v0  ;;  %s2894_s10 = scalar_lea.hbm %s3047_s9, %s1683_s11  ;;  %s2263_s4 = scalar_lea.vmem %s2262_s15, 256 }
  0xe1   : > { %p2264_p10 = scmp.lt.s32.totalorder %s2896_s14, %s2262_s15  ;;  %p2265_p3 = scmp.lt.s32.totalorder %s2263_s4, %s2257_s12 }
  0xe3   : > { %1738 = vmatpush3.bf16.msra.mxu0 %v2000_v25  ;;  %p2266_p13 = por %p2265_p3, %p2264_p10 }
  0xe4   : > { %1749 = vmatprep.subr.bf16.mxu0 %v2410_v0 }
  0xe5   : > { %p2267_p0 = pnand %p2266_p13, %p2260_p8 }
  0xe6   : > { %1740 = vmatmul.mubr.msk.bf16.vlgmr.msra.gmra.mxu0 %vm614_vm1, %v592_v27 }
  0xe7   : > { %1751 = vmatprep.mubr.msk.bf16.mxu0 %vm2411_vm0, %v2410_v0 }
 0x19d   : > { %v652_v11 = vpop.f32.mrf.mxu0  ;;  %v714_v13 = vpop.f32.mrf.mxu1 }
 0x19e   : > { %v653_v12 = vadd.f32 %v1656_v9, %v652_v11  ;;  %v715_v15 = vadd.f32 %v1660_v10, %v714_v13  ;;  %v1058_v11 = vsel %vm848_vm3, %v585_v8, 0 }
 0x19f   : > { %v1725_v14 = vpop.f32.mrf.mxu0  ;;  %v1733_v17 = vpop.f32.mrf.mxu1 }
 0x1a0   : > { %v2777_v16 = vpack.c.bf16 %v653_v12, %v653_v12  ;;  %v2779_v19 = vpack.c.bf16 %v715_v15, %v715_v15 }
 0x1a1   : > { %v655_v18 = vpop.f32.mrf.mxu0  ;;  %v717_v21 = vpop.f32.mrf.mxu1 }
 0x1a2   : > { %897 = vrot.lane.b32.xlu0 %v2777_v16, %s2412_s28  ;;  %v790_v20 = vsel %vm785_vm2, %v2777_v16, 0 }
 0x1a3   : > { %v1726_v22 = vpop.f32.mrf.mxu0  ;;  %1744 = vmatpush3.bf16.xpose.msra.mxu1 %v790_v20  ;;  %v1734_v23 = vpop.f32.mrf.mxu1 }
 0x1a4   : > { %1755 = vmatprep.subr.bf16.mxu1 %v2410_v0 }
 0x1a6   : > { %894 = vrot.lane.b32.xlu0 %v2779_v19, %s2412_s28  ;;  %v776_v46 = vpop.f32.mrf.mxu0 }
 0x1a7   : > { %v777_v53 = vadd.f32 %v1664_v52, %v776_v46 }
 0x1a8   : > { %v1741_v47 = vpop.f32.mrf.mxu0 }
 0x1a9   : > { %v2807_v54 = vpack.c.bf16 %v777_v53, %v777_v53 }
 0x1aa   : > { %1746 = vmatmul.mubr.msk.bf16.vlgmr.msra.gmra.mxu1 %vm785_vm2, %v2779_v19  ;;  %v779_v48 = vpop.f32.mrf.mxu0 }
 0x1ab   : > { %1757 = vmatprep.mubr.msk.bf16.mxu1 %vm2411_vm0, %v2410_v0  ;;  %v850_v55 = vsel %vm848_vm3, %v2807_v54, 0 }
 0x1ac   : > { %v1742_v49 = vpop.f32.mrf.mxu0  ;;  %1750 = vmatpush3.bf16.msra.mxu0 %v850_v55 }
 0x1ad   : > { %1761 = vmatprep.subr.bf16.mxu0 %v2410_v0 }
 0x214   : > { %v898_v28 = vpop.permute.xlu0 %897 }
 0x215   : > { %v903_v29 = vsel %vm785_vm2, %v898_v28, 0 }
 0x216   : > { %1756 = vmatpush3.bf16.xpose.msra.mxu1 %v903_v29 }
 0x217   : > { %1767 = vmatprep.subr.bf16.mxu1 %v2410_v0 }
 0x218   : > { %v895_v30 = vpop.permute.xlu0 %894 }
 0x21d   : > { %1758 = vmatmul.mubr.msk.bf16.vlgmr.msra.gmra.mxu1 %vm785_vm2, %v895_v30 }
 0x21e   : > { %1769 = vmatprep.mubr.msk.bf16.mxu1 %vm2411_vm0, %v2410_v0  ;;  %1768 = vmatpush3.bf16.msra.mxu1 %v1012_v3 }
 0x21f   : > { %1779 = vmatprep.subr.bf16.mxu1 %v2410_v0 }
 0x26a   : > { %v826_v31 = vpop.f32.mrf.mxu1 }
 0x26b   : > { %v832_v32 = vmul.f32 0.35355338, %v826_v31 }
 0x26c   : > { %v1747_v33 = vpop.f32.mrf.mxu1 }
 0x26d   : > { %v833_v34 = vsel %vm785_vm2, %v832_v32, -inf }
 0x26e   : > { %834 = vmax.xlane.f32.xlu1 %v833_v34  ;;  %v829_v35 = vpop.f32.mrf.mxu1 }
 0x270   : > { %v1748_v36 = vpop.f32.mrf.mxu1 }
 0x2dd   : > { %v939_v37 = vpop.f32.mrf.mxu1 }
 0x2de   : > { %v945_v38 = vmul.f32 0.35355338, %v939_v37 }
 0x2df   : > { %v1759_v39 = vpop.f32.mrf.mxu1 }
 0x2e0   : > { %v946_v40 = vsel %vm785_vm2, %v945_v38, -inf }
 0x2e1   : > { %947 = vmax.xlane.f32.xlu1 %v946_v40  ;;  %v942_v41 = vpop.f32.mrf.mxu1 }
 0x2e3   : > { %v1760_v42 = vpop.f32.mrf.mxu1 }
 0x2f7   : > { %v835_v43 = vpop.xlane.xlu1 %834 }
 0x2f8   : > { %v836_v44 = vsub.f32 %v832_v32, %v835_v43 }
 0x2fa   : > { %v837_v45 = vmul.f32 1.442695, %v836_v44 }
 0x2fc   : > { %2001 = vpow2.f32 %v837_v45 }
 0x309   : > { %v2002_v50 = vpop.eup %2001 }
 0x30a   : > { %v839_v51 = vsel %vm785_vm2, %v2002_v50, 0.0 }
 0x30b   : > { %840 = vadd.xlane.f32.xlu0 %v839_v51 }
 0x321   : > { %1163 = vrot.lane.b32.xlu0 %v2807_v54, %s2413_s30 }
 0x36a   : > { %v948_v56 = vpop.xlane.xlu1 %947 }
 0x36b   : > { %v949_v57 = vsub.f32 %v945_v38, %v948_v56 }
 0x36d   : > { %v950_v58 = vmul.f32 1.442695, %v949_v57 }
 0x36f   : > { %2003 = vpow2.f32 %v950_v58 }
 0x37c   : > { %v2004_v59 = vpop.eup %2003 }
 0x37d   : > { %v952_v60 = vsel %vm785_vm2, %v2004_v59, 0.0 }
 0x37e   : > { %953 = vadd.xlane.f32.xlu1 %v952_v60 }
 0x38f   : > { %959 = vrot.lane.b32.xlu1 %v2807_v54, %s2412_s28 }
 0x393   : > { %1102 = vrot.lane.b32.xlu1 %v2777_v16, %s2413_s30 }
 0x394   : > { %v841_v61 = vpop.xlane.xlu0 %840 }
 0x395   : > { %2005 = vrcp.f32 %v841_v61 }
 0x397   : > { %1100 = vrot.lane.b32.xlu1 %v2779_v19, %s2413_s30  ;;  %s3046_s30 = sld [smem:[#allocation41_spill]] }
 0x398   : > { %v1164_v12 = vpop.permute.xlu0 %1163 }
 0x399   : > { %v1169_v17 = vsel %vm848_vm3, %v1164_v12, 0  ;;  %v588_v12 = vld [vmem:[%s3043_s0 + $0xc] sm:$0xf] }
 0x3a2   : > { %v2006_v62 = vpop.eup %2005 }
 0x3a3   : > { %v843_v63 = vmul.f32 %v2006_v62, %v2002_v50 }
 0x3a5   : > { %v844_v1 = vpack.c.bf16 %v843_v63, %v843_v63 }
 0x3a7   : > { %1752 = vmatmul.mubr.msk.bf16.vlgmr.msra.gmra.mxu0 %vm785_vm2, %v844_v1 }
 0x3a8   : > { %1763 = vmatprep.mubr.msk.bf16.mxu0 %vm2411_vm0, %v2410_v0 }
 0x407   : > { %v954_v4 = vpop.xlane.xlu1 %953 }
 0x408   : > { %2007 = vrcp.f32 %v954_v4 }
 0x40b   : > { %v960_v5 = vpop.permute.xlu1 %959 }
 0x40c   : > { %v965_v6 = vsel %vm848_vm3, %v960_v5, 0 }
 0x40d   : > { %1762 = vmatpush3.bf16.msra.mxu0 %v965_v6 }
 0x40e   : > { %1773 = vmatprep.subr.bf16.mxu0 %v2410_v0 }
 0x40f   : > { %v1103_v21 = vpop.permute.xlu1 %1102 }
 0x410   : > { %v1108_v25 = vsel %vm785_vm2, %v1103_v21, 0 }
 0x413   : > { %v1101_v28 = vpop.permute.xlu1 %1100 }
 0x415   : > { %v2008_v7 = vpop.eup %2007 }
 0x416   : > { %v956_v9 = vmul.f32 %v2008_v7, %v2004_v59 }
 0x418   : > { %v957_v10 = vpack.c.bf16 %v956_v9, %v956_v9 }
 0x41a   : > { %1764 = vmatmul.mubr.msk.bf16.vlgmr.msra.gmra.mxu0 %vm785_vm2, %v957_v10 }
 0x41b   : > { %1774 = vmatpush3.bf16.msra.mxu0 %v1058_v11  ;;  %1775 = vmatprep.mubr.msk.bf16.mxu0 %vm2411_vm0, %v2410_v0 }
 0x41c   : > { %1785 = vmatprep.subr.bf16.mxu0 %v2410_v0 }
 0x467   : > { %v886_v13 = vpop.f32.mrf.mxu0 }
 0x468   : > { %v892_v14 = vpack.c.bf16 %v886_v13, %v886_v13  ;;  %v1375_v13 = vsel %vm848_vm3, %v588_v12, 0 }
 0x469   : > { %v1753_v15 = vpop.f32.mrf.mxu0 }
 0x46a   : > { %1776 = vmatmul.mubr.msk.bf16.vlgmr.msra.gmra.mxu0 %vm785_vm2, %v892_v14 }
 0x46b   : > { %1786 = vmatpush3.bf16.msra.mxu0 %v1169_v17  ;;  %v889_v18 = vpop.f32.mrf.mxu0  ;;  %1787 = vmatprep.mubr.msk.bf16.mxu0 %vm2411_vm0, %v2410_v0 }
 0x46c   : > { %1797 = vmatprep.subr.bf16.mxu0 %v2410_v0 }
 0x46d   : > { %v1754_v20 = vpop.f32.mrf.mxu0 }
 0x4da   : > { %v1001_v22 = vpop.f32.mrf.mxu0 }
 0x4db   : > { %v1007_v23 = vpack.c.bf16 %v1001_v22, %v1001_v22 }
 0x4dc   : > { %v1765_v24 = vpop.f32.mrf.mxu0 }
 0x4dd   : > { %1770 = vmatmul.mubr.msk.bf16.vlgmr.msra.gmra.mxu1 %vm785_vm2, %v1007_v23 }
 0x4de   : > { %1780 = vmatpush3.bf16.xpose.msra.mxu1 %v1108_v25  ;;  %v1004_v26 = vpop.f32.mrf.mxu0  ;;  %1781 = vmatprep.mubr.msk.bf16.mxu1 %vm2411_vm0, %v2410_v0 }
 0x4df   : > { %1791 = vmatprep.subr.bf16.mxu1 %v2410_v0 }
 0x4e0   : > { %v1766_v27 = vpop.f32.mrf.mxu0 }
 0x4e5   : > { %1782 = vmatmul.mubr.msk.bf16.vlgmr.msra.gmra.mxu1 %vm785_vm2, %v1101_v28 }
 0x4e6   : > { %1793 = vmatprep.mubr.msk.bf16.mxu1 %vm2411_vm0, %v2410_v0 }
 0x52a   : > { %v2849_v29 = vpop.f32.mrf.mxu0 }
 0x52c   : > { %v1777_v30 = vpop.f32.mrf.mxu0 }
 0x52e   : > { %v1097_v31 = vpop.f32.mrf.mxu0 }
 0x530   : > { %v1778_v32 = vpop.f32.mrf.mxu0 }
 0x59d   : > { %v1048_v33 = vpop.f32.mrf.mxu1 }
 0x59f   : > { %v1771_v34 = vpop.f32.mrf.mxu1 }
 0x5a1   : > { %v1051_v35 = vpop.f32.mrf.mxu1 }
 0x5a3   : > { %v1772_v36 = vpop.f32.mrf.mxu1 }
 0x5a5   : > { %v1144_v37 = vpop.f32.mrf.mxu1 }
 0x5a6   : > { %v1150_v38 = vmul.f32 0.35355338, %v1144_v37 }
 0x5a7   : > { %v1783_v39 = vpop.f32.mrf.mxu1 }
 0x5a8   : > { %v1151_v40 = vsel %vm785_vm2, %v1150_v38, -inf }
 0x5a9   : > { %1152 = vmax.xlane.f32.xlu1 %v1151_v40  ;;  %v1147_v41 = vpop.f32.mrf.mxu1 }
 0x5ab   : > { %v1784_v42 = vpop.f32.mrf.mxu1 }
 0x632   : > { %v1153_v43 = vpop.xlane.xlu1 %1152 }
 0x633   : > { %v1154_v44 = vsub.f32 %v1150_v38, %v1153_v43 }
 0x635   : > { %v1155_v45 = vmul.f32 1.442695, %v1154_v44 }
 0x637   : > { %2009 = vpow2.f32 %v1155_v45 }
 0x644   : > { %v2010_v46 = vpop.eup %2009 }
 0x645   : > { %v1157_v47 = vsel %vm785_vm2, %v2010_v46, 0.0 }
 0x646   : > { %1158 = vadd.xlane.f32.xlu0 %v1157_v47 }
 0x65c   : > { %1261 = vrot.lane.b32.xlu0 %v2777_v16, %s2414_s8 }
 0x660   : > { %1259 = vrot.lane.b32.xlu0 %v2779_v19, %s2414_s8  ;;  %v587_v19 = vld [vmem:[%s3043_s0 + $0x8] sm:$0xf] }
 0x661   : > { %v1216_v55 = vsel %vm848_vm3, %v587_v19, 0 }
 0x662   : > { %1792 = vmatpush3.bf16.msra.mxu1 %v1216_v55 }
 0x663   : > { %1803 = vmatprep.subr.bf16.mxu1 %v2410_v0 }
 0x6cf   : > { %v1159_v48 = vpop.xlane.xlu0 %1158 }
 0x6d0   : > { %2011 = vrcp.f32 %v1159_v48 }
 0x6d3   : > { %v1262_v51 = vpop.permute.xlu0 %1261 }
 0x6d4   : > { %v1267_v53 = vsel %vm785_vm2, %v1262_v51, 0 }
 0x6d7   : > { %v1260_v16 = vpop.permute.xlu0 %1259 }
 0x6dd   : > { %v2012_v49 = vpop.eup %2011 }
 0x6de   : > { %v1161_v50 = vmul.f32 %v2012_v49, %v2010_v46 }
 0x6e0   : > { %v1162_v52 = vpack.c.bf16 %v1161_v50, %v1161_v50 }
 0x6e2   : > { %1788 = vmatmul.mubr.msk.bf16.vlgmr.msra.gmra.mxu0 %vm785_vm2, %v1162_v52 }
 0x6e3   : > { %1798 = vmatpush3.bf16.xpose.msra.mxu0 %v1267_v53  ;;  %1799 = vmatprep.mubr.msk.bf16.mxu0 %vm2411_vm0, %v2410_v0 }
 0x6e4   : > { %1809 = vmatprep.subr.bf16.mxu0 %v2410_v0 }
 0x6ea   : > { %1800 = vmatmul.mubr.msk.bf16.vlgmr.msra.gmra.mxu0 %vm785_vm2, %v1260_v16 }
 0x6eb   : > { %1811 = vmatprep.mubr.msk.bf16.mxu0 %vm2411_vm0, %v2410_v0  ;;  %1810 = vmatpush3.bf16.msra.mxu0 %v1375_v13 }
 0x7a2   : > { %v1205_v56 = vpop.f32.mrf.mxu0 }
 0x7a3   : > { %v1211_v57 = vpack.c.bf16 %v1205_v56, %v1205_v56 }
 0x7a4   : > { %v1789_v58 = vpop.f32.mrf.mxu0 }
 0x7a5   : > { %1794 = vmatmul.mubr.msk.bf16.vlgmr.msra.gmra.mxu1 %vm785_vm2, %v1211_v57 }
 0x7a6   : > { %v1208_v59 = vpop.f32.mrf.mxu0  ;;  %1805 = vmatprep.mubr.msk.bf16.mxu1 %vm2411_vm0, %v2410_v0  ;;  %v1095_v0 = vadd.f32 %v2849_v29, %v1048_v33  ;;  %v1680_v29 = vld [vmem:[%s3046_s30] ss:$0 sm:$0xff] }
 0x7a8   : > { %v1790_v60 = vpop.f32.mrf.mxu0 }
 0x7aa   : > { %v1303_v61 = vpop.f32.mrf.mxu0 }
 0x7ab   : > { %v1309_v62 = vmul.f32 0.35355338, %v1303_v61 }
 0x7ac   : > { %v1801_v63 = vpop.f32.mrf.mxu0 }
 0x7ad   : > { %v1310_v1 = vsel %vm785_vm2, %v1309_v62, -inf }
 0x7ae   : > { %1311 = vmax.xlane.f32.xlu0 %v1310_v1  ;;  %v1306_v2 = vpop.f32.mrf.mxu0 }
 0x7b0   : > { %v1802_v3 = vpop.f32.mrf.mxu0 }
 0x837   : > { %v1312_v4 = vpop.xlane.xlu0 %1311 }
 0x838   : > { %v1313_v5 = vsub.f32 %v1309_v62, %v1312_v4 }
 0x83a   : > { %v1314_v6 = vmul.f32 1.442695, %v1313_v5 }
 0x83c   : > { %2013 = vpow2.f32 %v1314_v6 }
 0x849   : > { %v2014_v7 = vpop.eup %2013 }
 0x84a   : > { %v1316_v8 = vsel %vm785_vm2, %v2014_v7, 0.0 }
 0x84b   : > { %1317 = vadd.xlane.f32.xlu1 %v1316_v8 }
 0x85c   : > { %1322 = vrot.lane.b32.xlu1 %v2807_v54, %s2414_s8 }
 0x865   : > { %v1252_v9 = vpop.f32.mrf.mxu1 }
 0x866   : > { %v1258_v10 = vadd.f32 %v1252_v9, %v1095_v0 }
 0x867   : > { %v1795_v11 = vpop.f32.mrf.mxu1 }
 0x869   : > { %v1255_v14 = vpop.f32.mrf.mxu1 }
 0x86b   : > { %v1796_v15 = vpop.f32.mrf.mxu1 }
 0x8d4   : > { %v1318_v17 = vpop.xlane.xlu1 %1317 }
 0x8d5   : > { %2015 = vrcp.f32 %v1318_v17 }
 0x8d8   : > { %v1323_v18 = vpop.permute.xlu1 %1322 }
 0x8d9   : > { %v1328_v54 = vsel %vm848_vm3, %v1323_v18, 0 }
 0x8da   : > { %1804 = vmatpush3.bf16.msra.mxu1 %v1328_v54 }
 0x8e2   : > { %v2016_v20 = vpop.eup %2015 }
 0x8e3   : > { %v1320_v21 = vmul.f32 %v2016_v20, %v2014_v7 }
 0x8e5   : > { %v1321_v22 = vpack.c.bf16 %v1320_v21, %v1320_v21 }
 0x8e7   : > { %1806 = vmatmul.mubr.msk.bf16.vlgmr.msra.gmra.mxu1 %vm785_vm2, %v1321_v22 }
 0x9a7   : > { %v1364_v23 = vpop.f32.mrf.mxu1 }
 0x9a8   : > { %v1370_v24 = vpack.c.bf16 %v1364_v23, %v1364_v23 }
 0x9a9   : > { %v1807_v25 = vpop.f32.mrf.mxu1 }
 0x9aa   : > { %1812 = vmatmul.mubr.msk.bf16.vlgmr.msra.gmra.mxu0 %vm785_vm2, %v1370_v24 }
 0x9ab   : > { %v1367_v26 = vpop.f32.mrf.mxu1 }
 0x9ad   : > { %v1808_v27 = vpop.f32.mrf.mxu1 }
 0xa6a   : > { %v1411_v28 = vpop.f32.mrf.mxu0 }
 0xa6b   : > { %v1417_v30 = vadd.f32 %v1411_v28, %v1258_v10 }
 0xa6c   : > { %v1813_v31 = vpop.f32.mrf.mxu0 }
 0xa6d   : > { %v1425_v32 = vadd.f32 %v1680_v29, %v1417_v30 }
 0xa6e   : > { %v1414_v33 = vpop.f32.mrf.mxu0 }
 0xa6f   : > { %1426 = vst.msk [vmem:[%s571_s1] sm:$0xff] %vm614_vm1, %v1425_v32 }
 0xa70   : > { %v1814_v34 = vpop.f32.mrf.mxu0 }
 0xa71   : > { %2270 = shalt.err (!%p2267_p0)
}
 0xa72   : > { %s2271_s5 = scalar_lea.hbm %s2894_s10, 128  ;;  %s2275_s29 = scalar_lea.hbm %s3047_s9, 512 }
 0xa73   : > { %p2272_p7 = scmp.ne.s32.totalorder %s2894_s10, %s2271_s5  ;;  %p2276_p6 = scmp.lt.s32.totalorder %s2894_s10, %s3047_s9 }
 0xa74   : > { %p2277_p5 = scmp.lt.s32.totalorder %s2275_s29, %s2271_s5 }
 0xa75   : > { %p2273_p1 = pnand %p2272_p7, %p2684_p2 }
 0xa76   : > { %p2278_p4 = por %p2277_p5, %p2276_p6 }
 0xa77   : > { %p2274_p11 = pneg %p2273_p1 }
 0xa79   : > { %p2279_p9 = pnand %p2278_p4, %p2274_p11 }
 0xa7b   : > { %2282 = shalt.err (!%p2279_p9)
}
 0xa7c   : > { %1845 = dma.vmem_to_hbm [thread:$0]  (%p2684_p2), %s2896_s14, 128, %s2894_s10, %s1428_s23  }
 0xa7d PF: > { %p1893_p8 = scmp.ge.s32.totalorder %s2397_s27, 2  ;;  %s1455_s11 = sand.u32 1, %s2357_s17  }
 0xa7e   : > { %s1456_s1 = scalar_lea.sflag [#allocation4], %s1455_s11 }
 0xa7f   : > { %p1877_p10 = pnand %p1893_p8, %p2688_p12 }
 0xa81   : > { %p1878_p3 = pneg %p1877_p10 }
 0xa83   : > { %2352 = dma.done.wait (%p1878_p3), %s1456_s1, 128  }
 0xa84   : > { %2354 = vsyncadd (%p1878_p3), %s1456_s1, 4294967168  ;;  %s33_s27 = sadd.s32 1, %s2397_s27   ;;  %s3048_s20 = sld [smem:[#allocation25_spill]] }
 0xa85   : > { %p30_p13 = scmp.ge.s32.totalorder %s33_s27, 6   ;;  %s3049_s14 = sld [smem:[#allocation30_spill]] }
 0xa86   : > { %s3050_s6 = sld [smem:[#allocation31_spill]]  ;;  %s3051_s17 = smov %s2361_s18 }
 0xa87   : > { %s3052_s18 = smov %s2365_s19  ;;  %s3053_s19 = smov %s2701_s16 }
 0xa88   : > { %s3054_s21 = smov %s2377_s22  ;;  %s3055_s22 = smov %s2698_s7 }
 0xa89   : > { %s3056_s23 = smov %s2389_s25  ;;  %s3057_s24 = smov %s2393_s26 }
 0xa8a   :  { %32 = sbr.rel (!%p30_p13) target bundleno = 26 (0x1a), region = 157 }
 0xa8b   : > { %s3058_s25 = smov %s3049_s14 }
 0xa8c   : > { %s3059_s26 = smov %s3050_s6 }
 0xa8f   :  { %1461 = vsyncpa [#allocation3], 1 }
 0xa90   :  { %1463 = vsyncpa [#allocation3 + $0x1], 1 }
 0xa91   :  { %1464 = vsyncpa [#allocation6], 1 }
 0xa92   :  { %1466 = vsyncpa [#allocation6 + $0x1], 1 }
 0xa93   :  { %1467 = vsyncpa [#allocation9], 1 }
 0xa94   :  { %1468 = vsyncpa [#allocation12], 1 }
 0xa95   :  { %1469 = vsyncpa [#allocation15], 1 }
 0xa96   :  { %1470 = vsyncpa [#allocation4], 1 }
 0xa97   :  { %1472 = vsyncpa [#allocation4 + $0x1], 1 }

</bundles_post_ra>
